<compile_context>
chip_gen: v7x
topology: tpu7x:2x2x1
jax: 0.10.0
libtpu: 0.0.40
codegen_flags: <defaults>
</compile_context>

<pallas_src>
import jax
import jax.numpy as jnp
from jax.experimental import pallas as pl
from jax.experimental.pallas import tpu as pltpu


def _hardsigmoid_kernel(x_ref, o_ref):
    x = x_ref[...]
    # relu6(x + 3) / 6 == clamp(x + 3, 0, 6) * (1/6); weak-typed constants keep
    # the compute in the input dtype (f32 or bf16).
    y = jnp.minimum(jnp.maximum(x + 3.0, 0.0), 6.0) * (1.0 / 6.0)
    o_ref[...] = y.astype(o_ref.dtype)


_LANE_CHOICES = (1024, 512, 256, 128)  # lane-dense widths, multiples of 128
_TARGET_BLOCK_BYTES = 4 << 20          # ~4 MiB per VMEM buffer (4 bufs = 16 MiB)
_ROW_GRAN = 256                        # row-tile granularity (mult. of 8/16/32)
_PALLAS_MIN_BYTES = 4 << 20            # below this, XLA-fused clip wins
_VMEM_LIMIT_BYTES = 32 << 20           # clears v5e's 16 MiB scoped default


def _xla_hardsigmoid(x: jax.Array) -> jax.Array:
    return (jnp.clip(x + 3.0, 0.0, 6.0) * (1.0 / 6.0)).astype(x.dtype)


def _round_up(a: int, b: int) -> int:
    return ((a + b - 1) // b) * b


def custom_activation(x: jax.Array, *, force_pallas: bool = False,
                      donate_input: bool = False) -> jax.Array:
    """Applies relu6(x + 3) / 6 elementwise. Accepts any shape (e.g. NCHW)."""
    orig_shape = x.shape
    total = x.size
    if total == 0:
        return x

    itemsize = jnp.dtype(x.dtype).itemsize
    nbytes = total * itemsize

    # Tiny/mid tensors: a standalone kernel launch costs more than the math.
    if (not force_pallas) and nbytes < _PALLAS_MIN_BYTES:
        return _xla_hardsigmoid(x)

    # Pick the widest lane count that divides the tensor exactly -> no padding.
    lanes = next((l for l in _LANE_CHOICES if total % l == 0), None)
    flat = x.reshape(-1)
    pad = 0
    if lanes is None:
        # Rare ragged case: pad to 128 lanes (costs an extra HBM pass).
        lanes = 128
        pad = (-total) % lanes
        flat = jnp.pad(flat, (0, pad))
    rows = flat.shape[0] // lanes
    x2d = flat.reshape(rows, lanes)

    # Row tile: target ~4 MiB per buffer, dtype- and lane-scaled.
    max_rows = max(_ROW_GRAN,
                   (_TARGET_BLOCK_BYTES // (lanes * itemsize)) // _ROW_GRAN * _ROW_GRAN)
    if rows > max_rows:
        row_tile = max_rows
    elif rows >= 2 * _ROW_GRAN:
        # Fits in one block, but split into 2 grid steps so v7x's two
        # TensorCores both stream HBM (the axis is marked "parallel").
        row_tile = _round_up(pl.cdiv(rows, 2), _ROW_GRAN)
    else:
        row_tile = rows  # full extent: always a legal block shape
    grid = (pl.cdiv(rows, row_tile),)

    cost = pl.CostEstimate(
        flops=4 * total,          # add, max, min, mul
        transcendentals=0,
        bytes_accessed=2 * nbytes,
    )

    out2d = pl.pallas_call(
        _hardsigmoid_kernel,
        out_shape=jax.ShapeDtypeStruct(x2d.shape, x.dtype),
        grid=grid,
        in_specs=[pl.BlockSpec((row_tile, lanes), lambda i: (i, 0))],
        out_specs=pl.BlockSpec((row_tile, lanes), lambda i: (i, 0)),
        compiler_params=pltpu.CompilerParams(
            dimension_semantics=("parallel",),
            vmem_limit_bytes=_VMEM_LIMIT_BYTES,
        ),
        cost_estimate=cost,
        input_output_aliases=({0: 0} if donate_input else {}),
    )(x2d)

    out_flat = out2d.reshape(-1)
    if pad:
        out_flat = out_flat[:total]
    return out_flat.reshape(orig_shape)


def _reference(x):
    return (jnp.clip(x + 3.0, 0.0, 6.0) / 6.0).astype(x.dtype)


if __name__ == "__main__":
    key = jax.random.PRNGKey(0)
    k1, k2, k3 = jax.random.split(key, 3)

    # 1) Module-sized NCHW input; force the Pallas path (single full-extent block,
    #    lanes=1024 divides 2*4*16*16 exactly -> no padding).
    x1 = jax.random.normal(k1, (2, 4, 16, 16), dtype=jnp.float32) * 4.0
    y1 = jax.block_until_ready(custom_activation(x1, force_pallas=True))
    assert y1.shape == x1.shape and y1.dtype == x1.dtype
    assert jnp.allclose(y1, _reference(x1), atol=1e-6, rtol=1e-6), "mismatch (small)"

    # 2) Size divisible by 128 but not 256: adaptive lane width (128), a 2-step
    #    "parallel" grid (dual-TC split) and a partial trailing row block,
    #    all without any pad/slice HBM round-trip.
    x2 = jax.random.normal(k2, (4, 8, 130, 130), dtype=jnp.float32) * 4.0
    y2 = jax.block_until_ready(custom_activation(x2, force_pallas=True))
    assert y2.shape == x2.shape and y2.dtype == x2.dtype
    assert jnp.allclose(y2, _reference(x2), atol=1e-6, rtol=1e-6), "mismatch (tiled)"

    # 3) bf16 input — exercises dtype handling and the cast on the store.
    x3 = (jax.random.normal(k3, (2, 4, 32, 32), dtype=jnp.float32) * 4.0).astype(jnp.bfloat16)
    y3 = jax.block_until_ready(custom_activation(x3, force_pallas=True))
    assert y3.shape == x3.shape and y3.dtype == x3.dtype
    assert jnp.allclose(y3.astype(jnp.float32), _reference(x3).astype(jnp.float32),
                        atol=2e-2, rtol=2e-2), "mismatch (bf16)"

    print("KERNEL_OK")
</pallas_src>

<mosaic_0001>
module attributes {stable_mosaic.version = 11 : i64} {
  func.func @_hardsigmoid_kernel(%arg0: i32, %arg1: memref<2x1024xf32, #tpu.memory_space<vmem>>, %arg2: memref<2x1024xf32, #tpu.memory_space<vmem>>) attributes {dimension_semantics = [#tpu.dimension_semantics<parallel>], iteration_bounds = array<i64: 1>, scalar_prefetch = 0 : i64, scratch_operands = 0 : i64, tpu.core_type = #tpu.core_type<tc>, window_params = [{transform_indices = @transform_0, window_bounds = array<i64: 2, 1024>}, {transform_indices = @transform_1, window_bounds = array<i64: 2, 1024>}]} {
    %c0 = arith.constant 0 : index
    %c0_0 = arith.constant 0 : index
    %0 = vector.load %arg1[%c0, %c0_0] : memref<2x1024xf32, #tpu.memory_space<vmem>>, vector<2x1024xf32>
    %cst = arith.constant 3.000000e+00 : f32
    %1 = vector.broadcast %cst : f32 to vector<2x1024xf32>
    %2 = arith.addf %0, %1 : vector<2x1024xf32>
    %cst_1 = arith.constant 0.000000e+00 : f32
    %3 = vector.broadcast %cst_1 : f32 to vector<2x1024xf32>
    %4 = arith.maximumf %2, %3 : vector<2x1024xf32>
    %cst_2 = arith.constant 6.000000e+00 : f32
    %5 = vector.broadcast %cst_2 : f32 to vector<2x1024xf32>
    %6 = arith.minimumf %4, %5 : vector<2x1024xf32>
    %cst_3 = arith.constant 0.166666672 : f32
    %7 = vector.broadcast %cst_3 : f32 to vector<2x1024xf32>
    %8 = arith.mulf %6, %7 : vector<2x1024xf32>
    %c0_4 = arith.constant 0 : index
    %c0_5 = arith.constant 0 : index
    %9 = vector.load %arg2[%c0_4, %c0_5] : memref<2x1024xf32, #tpu.memory_space<vmem>>, vector<2x1024xf32>
    tpu.vector_store %arg2[%c0_4, %c0_5], %8 {strides = array<i32>} : memref<2x1024xf32, #tpu.memory_space<vmem>>, vector<2x1024xf32>,
    return
  }
  func.func @transform_0(%arg0: i32) -> (i32, i32) {
    %c0_i32 = arith.constant 0 : i32
    %c0_i32_0 = arith.constant 0 : i32
    return %arg0, %c0_i32 : i32, i32
  }
  func.func @transform_1(%arg0: i32) -> (i32, i32) {
    %c0_i32 = arith.constant 0 : i32
    %c0_i32_0 = arith.constant 0 : i32
    return %arg0, %c0_i32 : i32, i32
  }
}

</mosaic_0001>

<bundles_post_ra>
// kernel: tpu_custom_call.1
= control target key start
LH: loop header
LB: loop body
LE: loop exit
PB: predicated region body
PF: predicated region fallthrough
CT: control target
= control target key end

     0   :  { %6 = vsyncpa [#allocation3], 0  ;;  %s134_s0 = inlined_call_operand.hbm [shape: f32[2,1024], index: 0, kind: input, shape index: {}]   ;;  %s135_s1 = inlined_call_operand.hbm [shape: f32[2,1024], index: 1, kind: output, shape index: {}]  }
   0x1   :  { %7 = vsyncpa [#allocation4], 0  ;;  %s98_s6 = smov [#allocation2]   ;;  %s50_s10 = scalar_lea.hbm %s134_s0, 256 }
   0x2   :  { %s14_s7 = sshll.u32 %s98_s6, 4  ;;  %p51_p0 = scmp.ne.s32.totalorder %s134_s0, %s50_s10  ;;  %s15_s7 = int_to_ptr.vmem [resolvable:$true] %s14_s7 }
   0x3   :  { %p54_p1 = scmp.lt.u32.totalorder %s50_s10, %s134_s0 }
   0x5   :  { %p56_p2 = pnand %p54_p1, %p51_p0 }
   0x7   :  { %59 = shalt.err (!%p56_p2)
}
   0x8   :  { %s60_s15 = scalar_lea.vmem %s15_s7, 256  ;;  %p65_p4 = scmp.lt.s32.totalorder %s15_s7, %s15_s7 }
   0x9   :  { %p61_p3 = scmp.ne.s32.totalorder %s15_s7, %s60_s15  ;;  %p66_p5 = scmp.lt.s32.totalorder %s60_s15, %s60_s15 }
   0xb   :  { %p67_p6 = por %p66_p5, %p65_p4 }
   0xd   :  { %p68_p7 = pnand %p67_p6, %p61_p3 }
   0xf   :  { %71 = shalt.err (!%p68_p7)
}
  0x10   :  { %17 = dma.hbm_to_vmem [thread:$0]  %s134_s0, 256, %s15_s7, [#allocation3]  }
  0x11   :  { %94 = dma.done.wait [#allocation3], 256  }
  0x12   :  { %95 = vsyncadd [#allocation3], 4294967040  ;;  %v21_v0 = vld [vmem:[#allocation2] sm:$0xff]  ;;  %v22_v1 = vld [vmem:[#allocation2 + $0x8] sm:$0xff]  ;;  %s99_s18 = smov [#allocation5]  }
  0x13   :  { %v23_v2 = vadd.f32 3.0, %v21_v0  ;;  %v24_v3 = vadd.f32 3.0, %v22_v1  ;;  %s39_s19 = sshll.u32 %s99_s18, 4  ;;  %s40_s19 = int_to_ptr.vmem [resolvable:$true] %s39_s19 }
  0x14   :  { %s72_s20 = scalar_lea.vmem %s40_s19, 256  ;;  %p77_p9 = scmp.lt.s32.totalorder %s40_s19, %s40_s19 }
  0x15   :  { %v25_v4 = vmax.f32 %v23_v2, 0.0  ;;  %v26_v5 = vmax.f32 %v24_v3, 0.0  ;;  %p73_p8 = scmp.ne.s32.totalorder %s40_s19, %s72_s20  ;;  %p78_p10 = scmp.lt.s32.totalorder %s72_s20, %s72_s20 }
  0x17   :  { %v27_v6 = vmin.f32 %v25_v4, 6.0  ;;  %v28_v7 = vmin.f32 %v26_v5, 6.0  ;;  %p79_p11 = por %p78_p10, %p77_p9 }
  0x19   :  { %v29_v8 = vmul.f32 0.16666667, %v27_v6  ;;  %v30_v9 = vmul.f32 0.16666667, %v28_v7  ;;  %p80_p12 = pnand %p79_p11, %p73_p8 }
  0x1b   :  { %31 = vst [vmem:[#allocation5] sm:$0xff] %v29_v8  ;;  %32 = vst [vmem:[#allocation5 + $0x8] sm:$0xff] %v30_v9 }
  0x1c   :  { %83 = shalt.err (!%p80_p12)
}
  0x1d   :  { %s84_s22 = scalar_lea.hbm %s135_s1, 256 }
  0x1e   :  { %p85_p13 = scmp.ne.s32.totalorder %s135_s1, %s84_s22  ;;  %p88_p0 = scmp.lt.u32.totalorder %s84_s22, %s135_s1 }
  0x20   :  { %p90_p1 = pnand %p88_p0, %p85_p13 }
  0x22   :  { %93 = shalt.err (!%p90_p1)
}
  0x23   :  { %42 = dma.vmem_to_hbm [thread:$0]  %s40_s19, 256, %s135_s1, [#allocation4]  }
  0x24   :  { %96 = dma.done.wait [#allocation4], 256  }
  0x25   :  { %97 = vsyncadd [#allocation4], 4294967040 }
  0x26   :  { %46 = vsyncpa [#allocation3], 1 }
  0x27   :  { %47 = vsyncpa [#allocation4], 1 }

</bundles_post_ra>
